<compile_context>
chip_gen: v6e
topology: v6e:2x2x1
jax: 0.10.0
libtpu: 0.0.40
codegen_flags: <defaults>
</compile_context>

<pallas_src>
import math

import jax
import jax.numpy as jnp
from jax import lax
from jax.experimental import pallas as pl
from jax.experimental.pallas import tpu as pltpu

# ----------------------------- config (small, deterministic) -----------------------------
B = 2          # batch
S = 8          # seq_len (== block_size)
E = 32         # n_embd
H = 4          # n_head
D = E // H     # head_dim
T = B * S      # tokens handled per (single) kernel invocation
EPS = 1e-5     # nn.LayerNorm default eps


def _layer_norm(v, g, b):
    # v: (T, E), g/b: (1, E) — torch.nn.LayerNorm over the last dim (biased variance).
    mu = jnp.mean(v, axis=-1, keepdims=True)
    var = jnp.mean((v - mu) ** 2, axis=-1, keepdims=True)
    return (v - mu) * lax.rsqrt(var + EPS) * g + b


def transformer_block_kernel(x_ref, w_in_ref, w2_ref, ln_ref, out_ref):
    x = x_ref[...]                                    # (T, E) = (B*S, E)
    w_in = w_in_ref[...]                              # (E, 8E) = [Wqkv(q-scaled) | Wproj | W1]
    ln = ln_ref[...]                                  # (4, E)  = [g1; b1; g2; b2]

    # ---------------- multi-head self-attention ----------------
    # ONE lane-dense MXU push for q/k/v of every head (scale already folded into Q columns).
    qkv = jnp.dot(x, w_in[:, 0:3 * E],
                  preferred_element_type=jnp.float32)                 # (T, 3E) = (16, 96)

    # Causal mask built exactly once (shared across heads).
    rows = lax.broadcasted_iota(jnp.int32, (B, S, S), 1)              # query index
    cols = lax.broadcasted_iota(jnp.int32, (B, S, S), 2)              # key index
    causal = cols <= rows

    ctx_heads = []
    for h in range(H):                                # static 4-way unroll
        # Static lane slices of the QKV result; (T, D) -> (B, S, D) splits the 8-aligned
        # sublane/major axis only (pure relabel, no relayout).
        q_h = qkv[:, 0 * E + h * D:0 * E + (h + 1) * D].reshape(B, S, D)
        k_h = qkv[:, 1 * E + h * D:1 * E + (h + 1) * D].reshape(B, S, D)
        v_h = qkv[:, 2 * E + h * D:2 * E + (h + 1) * D].reshape(B, S, D)

        s_h = jnp.einsum('bqd,bkd->bqk', q_h, k_h,
                         preferred_element_type=jnp.float32)          # (B, S, S)
        s_h = jnp.where(causal, s_h, jnp.float32(-1e30))
        m_h = jnp.max(s_h, axis=-1, keepdims=True)
        p_h = jnp.exp(s_h - m_h)
        p_h = p_h / jnp.sum(p_h, axis=-1, keepdims=True)              # exact softmax denom
        c_h = jnp.einsum('bqk,bkd->bqd', p_h, v_h,
                         preferred_element_type=jnp.float32)          # (B, S, D)
        ctx_heads.append(c_h.reshape(T, D))

    # Lane-concat heads back to (T, E) so the output projection contracts over all H*D
    # inputs in a single MXU push (head-sum accumulates inside the MXU, no VPU tree-sum).
    ctx = jnp.concatenate(ctx_heads, axis=-1)                         # (T, E)
    y = jnp.dot(ctx, w_in[:, 3 * E:4 * E],
                preferred_element_type=jnp.float32)                   # (T, E)

    # residual + post-norm of the sublayer output (matches x + LN(attn(x)))
    x1 = x + _layer_norm(y, ln[0:1, :], ln[1:2, :])

    # ---------------- feed-forward (SiLU MLP, 4x expansion) ----------------
    hdn = jnp.dot(x1, w_in[:, 4 * E:8 * E],
                  preferred_element_type=jnp.float32)                 # (T, 4E); W1 slice is
    hdn = hdn * (1.0 / (1.0 + jnp.exp(-hdn)))                         # lane-aligned at 128
    ff = jnp.dot(hdn, w2_ref[...], preferred_element_type=jnp.float32)  # (T, E)

    out_ref[...] = (x1 + _layer_norm(ff, ln[2:3, :], ln[3:4, :])).astype(out_ref.dtype)


def prepare_params(wqkv, wproj, w1, w2, g1, b1, g2, b2):
    """One-time parameter packing (run at weight-load time, NOT per forward call)."""
    scale = 1.0 / math.sqrt(D)
    # Fold the attention scale into the Q columns; pack [Wqkv | Wproj | W1] -> (E, 8E).
    w_in = jnp.concatenate(
        [wqkv[:, :E] * scale, wqkv[:, E:], wproj, w1], axis=1)        # (32, 256)
    ln = jnp.stack([g1, b1, g2, b2], axis=0)                          # (4, 32)
    return w_in, w2, ln


@jax.jit
def transformer_block(x, w_in, w2, ln):
    # Only a free view-reshape happens per call; all weight re-layouts are pre-done.
    x2 = x.reshape(B * S, E)
    out2 = pl.pallas_call(
        transformer_block_kernel,
        out_shape=jax.ShapeDtypeStruct((B * S, E), x.dtype),
        # No grid: single invocation, whole (tiny) problem resident in VMEM.
        in_specs=[pl.BlockSpec(memory_space=pltpu.MemorySpace.VMEM)] * 4,
        out_specs=pl.BlockSpec(memory_space=pltpu.MemorySpace.VMEM),
    )(x2, w_in, w2, ln)
    return out2.reshape(B, S, E)


# ----------------------------- pure-JAX reference (sanity check) -----------------------------
def reference(x, wqkv, wproj, w1, w2, g1, b1, g2, b2):
    def ln(v, g, b):
        mu = v.mean(-1, keepdims=True)
        var = ((v - mu) ** 2).mean(-1, keepdims=True)
        return (v - mu) / jnp.sqrt(var + EPS) * g + b

    qkv = x @ wqkv
    q, k, v = jnp.split(qkv, 3, axis=-1)
    q = q.reshape(B, S, H, D).transpose(0, 2, 1, 3)
    k = k.reshape(B, S, H, D).transpose(0, 2, 1, 3)
    v = v.reshape(B, S, H, D).transpose(0, 2, 1, 3)
    att = jnp.einsum("bhqd,bhkd->bhqk", q, k) / math.sqrt(D)
    mask = jnp.tril(jnp.ones((S, S), dtype=bool))
    att = jnp.where(mask[None, None], att, -jnp.inf)
    att = jax.nn.softmax(att, axis=-1)
    y = jnp.einsum("bhqk,bhkd->bhqd", att, v).transpose(0, 2, 1, 3).reshape(B, S, E)
    y = y @ wproj
    x1 = x + ln(y, g1, b1)
    h = x1 @ w1
    h = h * jax.nn.sigmoid(h)
    ff = h @ w2
    return x1 + ln(ff, g2, b2)


if __name__ == "__main__":
    key = jax.random.PRNGKey(0)
    kx, k1, k2, k3, k4, k5, k6 = jax.random.split(key, 7)

    x = jax.random.normal(kx, (B, S, E), dtype=jnp.float32)

    # Deterministic synthetic parameters (nn.Linear stores (out,in); transposed (in,out) kept).
    wqkv = jax.random.normal(k1, (E, 3 * E), dtype=jnp.float32) * 0.05
    wproj = jax.random.normal(k2, (E, E), dtype=jnp.float32) * 0.05
    w1 = jax.random.normal(k3, (E, 4 * E), dtype=jnp.float32) * 0.05
    w2 = jax.random.normal(k4, (4 * E, E), dtype=jnp.float32) * 0.05
    # Non-trivial LayerNorm affine params to make the check meaningful.
    g1 = 1.0 + 0.1 * jax.random.normal(k5, (E,), dtype=jnp.float32)
    b1 = 0.1 * jax.random.normal(k6, (E,), dtype=jnp.float32)
    g2 = 1.0 - 0.05 * g1
    b2 = 0.05 * b1 - 0.02

    # One-time parameter packing (outside the jitted hot path).
    w_in, w2p, ln_p = prepare_params(wqkv, wproj, w1, w2, g1, b1, g2, b2)

    out = transformer_block(x, w_in, w2p, ln_p)
    out = jax.block_until_ready(out)

    ref = reference(x, wqkv, wproj, w1, w2, g1, b1, g2, b2)
    assert out.shape == (B, S, E)
    max_err = float(jnp.max(jnp.abs(out - ref)))
    assert jnp.allclose(out, ref, atol=1e-4, rtol=1e-4), max_err

    # TODO(synk): dropout (config.dropout) is treated as 0.0 / identity; add pltpu PRNG-based
    # masking if a training-mode forward is ever needed.
    print("KERNEL_OK")
</pallas_src>

<mosaic_0001>
module attributes {stable_mosaic.version = 11 : i64} {
  func.func @transformer_block_kernel(%arg0: memref<16x32xf32, #tpu.memory_space<vmem>>, %arg1: memref<32x256xf32, #tpu.memory_space<vmem>>, %arg2: memref<128x32xf32, #tpu.memory_space<vmem>>, %arg3: memref<4x32xf32, #tpu.memory_space<vmem>>, %arg4: memref<16x32xf32, #tpu.memory_space<vmem>>) attributes {dimension_semantics = [], scalar_prefetch = 0 : i64, scratch_operands = 0 : i64, tpu.core_type = #tpu.core_type<tc>} {
    %c0 = arith.constant 0 : index
    %c0_0 = arith.constant 0 : index
    %0 = vector.load %arg0[%c0, %c0_0] : memref<16x32xf32, #tpu.memory_space<vmem>>, vector<16x32xf32>
    %c0_1 = arith.constant 0 : index
    %c0_2 = arith.constant 0 : index
    %1 = vector.load %arg1[%c0_1, %c0_2] : memref<32x256xf32, #tpu.memory_space<vmem>>, vector<32x256xf32>
    %c0_3 = arith.constant 0 : index
    %c0_4 = arith.constant 0 : index
    %2 = vector.load %arg3[%c0_3, %c0_4] : memref<4x32xf32, #tpu.memory_space<vmem>>, vector<4x32xf32>
    %3 = vector.extract_strided_slice %1 {offsets = [0, 0], sizes = [32, 96], strides = [1, 1]} : vector<32x256xf32> to vector<32x96xf32>
    %cst = arith.constant dense<0.000000e+00> : vector<16x96xf32>
    %4 = tpu.matmul %0, %3, %cst {dimension_numbers = #tpu.dot_dimension_numbers<[1], [0], [0], [1], [0, 0, 1, 1], [], []>} : vector<16x32xf32>, vector<32x96xf32>, vector<16x96xf32> -> vector<16x96xf32>
    %5 = tpu.iota {dimensions = array<i32: 1>} : vector<2x8x8xi32>
    %6 = tpu.iota {dimensions = array<i32: 2>} : vector<2x8x8xi32>
    %7 = arith.cmpi sle, %6, %5 : vector<2x8x8xi32>
    %8 = vector.extract_strided_slice %4 {offsets = [0, 0], sizes = [16, 8], strides = [1, 1]} : vector<16x96xf32> to vector<16x8xf32>
    %9 = vector.shape_cast %8 : vector<16x8xf32> to vector<2x8x8xf32>
    %10 = vector.extract_strided_slice %4 {offsets = [0, 32], sizes = [16, 8], strides = [1, 1]} : vector<16x96xf32> to vector<16x8xf32>
    %11 = vector.shape_cast %10 : vector<16x8xf32> to vector<2x8x8xf32>
    %12 = vector.extract_strided_slice %4 {offsets = [0, 64], sizes = [16, 8], strides = [1, 1]} : vector<16x96xf32> to vector<16x8xf32>
    %13 = vector.shape_cast %12 : vector<16x8xf32> to vector<2x8x8xf32>
    "tpu.trace_start"() <{level = 10 : i32, message = "bqd,bkd->bqk"}> : () -> ()
    %cst_5 = arith.constant dense<0.000000e+00> : vector<2x8x8xf32>
    %14 = tpu.matmul %9, %11, %cst_5 {dimension_numbers = #tpu.dot_dimension_numbers<[2], [2], [1], [1], [0, 0, 0, 1, 1, 1], [0], [0]>} : vector<2x8x8xf32>, vector<2x8x8xf32>, vector<2x8x8xf32> -> vector<2x8x8xf32>
    %cst_6 = arith.constant -1.000000e+30 : f32
    "tpu.trace_stop"() : () -> ()
    %15 = vector.broadcast %cst_6 : f32 to vector<2x8x8xf32>
    %16 = arith.select %7, %14, %15 : vector<2x8x8xi1>, vector<2x8x8xf32>
    %cst_7 = arith.constant dense<0xFF800000> : vector<2x8xf32>
    %17 = vector.multi_reduction <maximumf>, %16, %cst_7 [2] : vector<2x8x8xf32> to vector<2x8xf32>
    %18 = vector.shape_cast %17 : vector<2x8xf32> to vector<2x8x1xf32>
    %19 = vector.broadcast %18 : vector<2x8x1xf32> to vector<2x8x8xf32>
    %20 = arith.subf %16, %19 : vector<2x8x8xf32>
    %21 = math.exp %20 : vector<2x8x8xf32>
    %cst_8 = arith.constant dense<0.000000e+00> : vector<2x8xf32>
    %22 = vector.multi_reduction <add>, %21, %cst_8 [2] : vector<2x8x8xf32> to vector<2x8xf32>
    %23 = vector.shape_cast %22 : vector<2x8xf32> to vector<2x8x1xf32>
    %24 = vector.broadcast %23 : vector<2x8x1xf32> to vector<2x8x8xf32>
    %25 = arith.divf %21, %24 : vector<2x8x8xf32>
    "tpu.trace_start"() <{level = 10 : i32, message = "bqk,bkd->bqd"}> : () -> ()
    %cst_9 = arith.constant dense<0.000000e+00> : vector<2x8x8xf32>
    %26 = tpu.matmul %25, %13, %cst_9 {dimension_numbers = #tpu.dot_dimension_numbers<[2], [1], [1], [2], [0, 0, 0, 1, 1, 2], [0], [0]>} : vector<2x8x8xf32>, vector<2x8x8xf32>, vector<2x8x8xf32> -> vector<2x8x8xf32>
    "tpu.trace_stop"() : () -> ()
    %27 = vector.shape_cast %26 : vector<2x8x8xf32> to vector<16x8xf32>
    %28 = vector.extract_strided_slice %4 {offsets = [0, 8], sizes = [16, 8], strides = [1, 1]} : vector<16x96xf32> to vector<16x8xf32>
    %29 = vector.shape_cast %28 : vector<16x8xf32> to vector<2x8x8xf32>
    %30 = vector.extract_strided_slice %4 {offsets = [0, 40], sizes = [16, 8], strides = [1, 1]} : vector<16x96xf32> to vector<16x8xf32>
    %31 = vector.shape_cast %30 : vector<16x8xf32> to vector<2x8x8xf32>
    %32 = vector.extract_strided_slice %4 {offsets = [0, 72], sizes = [16, 8], strides = [1, 1]} : vector<16x96xf32> to vector<16x8xf32>
    %33 = vector.shape_cast %32 : vector<16x8xf32> to vector<2x8x8xf32>
    "tpu.trace_start"() <{level = 10 : i32, message = "bqd,bkd->bqk"}> : () -> ()
    %cst_10 = arith.constant dense<0.000000e+00> : vector<2x8x8xf32>
    %34 = tpu.matmul %29, %31, %cst_10 {dimension_numbers = #tpu.dot_dimension_numbers<[2], [2], [1], [1], [0, 0, 0, 1, 1, 1], [0], [0]>} : vector<2x8x8xf32>, vector<2x8x8xf32>, vector<2x8x8xf32> -> vector<2x8x8xf32>
    %cst_11 = arith.constant -1.000000e+30 : f32
    "tpu.trace_stop"() : () -> ()
    %35 = vector.broadcast %cst_11 : f32 to vector<2x8x8xf32>
    %36 = arith.select %7, %34, %35 : vector<2x8x8xi1>, vector<2x8x8xf32>
    %cst_12 = arith.constant dense<0xFF800000> : vector<2x8xf32>
    %37 = vector.multi_reduction <maximumf>, %36, %cst_12 [2] : vector<2x8x8xf32> to vector<2x8xf32>
    %38 = vector.shape_cast %37 : vector<2x8xf32> to vector<2x8x1xf32>
    %39 = vector.broadcast %38 : vector<2x8x1xf32> to vector<2x8x8xf32>
    %40 = arith.subf %36, %39 : vector<2x8x8xf32>
    %41 = math.exp %40 : vector<2x8x8xf32>
    %cst_13 = arith.constant dense<0.000000e+00> : vector<2x8xf32>
    %42 = vector.multi_reduction <add>, %41, %cst_13 [2] : vector<2x8x8xf32> to vector<2x8xf32>
    %43 = vector.shape_cast %42 : vector<2x8xf32> to vector<2x8x1xf32>
    %44 = vector.broadcast %43 : vector<2x8x1xf32> to vector<2x8x8xf32>
    %45 = arith.divf %41, %44 : vector<2x8x8xf32>
    "tpu.trace_start"() <{level = 10 : i32, message = "bqk,bkd->bqd"}> : () -> ()
    %cst_14 = arith.constant dense<0.000000e+00> : vector<2x8x8xf32>
    %46 = tpu.matmul %45, %33, %cst_14 {dimension_numbers = #tpu.dot_dimension_numbers<[2], [1], [1], [2], [0, 0, 0, 1, 1, 2], [0], [0]>} : vector<2x8x8xf32>, vector<2x8x8xf32>, vector<2x8x8xf32> -> vector<2x8x8xf32>
    "tpu.trace_stop"() : () -> ()
    %47 = vector.shape_cast %46 : vector<2x8x8xf32> to vector<16x8xf32>
    %48 = vector.extract_strided_slice %4 {offsets = [0, 16], sizes = [16, 8], strides = [1, 1]} : vector<16x96xf32> to vector<16x8xf32>
    %49 = vector.shape_cast %48 : vector<16x8xf32> to vector<2x8x8xf32>
    %50 = vector.extract_strided_slice %4 {offsets = [0, 48], sizes = [16, 8], strides = [1, 1]} : vector<16x96xf32> to vector<16x8xf32>
    %51 = vector.shape_cast %50 : vector<16x8xf32> to vector<2x8x8xf32>
    %52 = vector.extract_strided_slice %4 {offsets = [0, 80], sizes = [16, 8], strides = [1, 1]} : vector<16x96xf32> to vector<16x8xf32>
    %53 = vector.shape_cast %52 : vector<16x8xf32> to vector<2x8x8xf32>
    "tpu.trace_start"() <{level = 10 : i32, message = "bqd,bkd->bqk"}> : () -> ()
    %cst_15 = arith.constant dense<0.000000e+00> : vector<2x8x8xf32>
    %54 = tpu.matmul %49, %51, %cst_15 {dimension_numbers = #tpu.dot_dimension_numbers<[2], [2], [1], [1], [0, 0, 0, 1, 1, 1], [0], [0]>} : vector<2x8x8xf32>, vector<2x8x8xf32>, vector<2x8x8xf32> -> vector<2x8x8xf32>
    %cst_16 = arith.constant -1.000000e+30 : f32
    "tpu.trace_stop"() : () -> ()
    %55 = vector.broadcast %cst_16 : f32 to vector<2x8x8xf32>
    %56 = arith.select %7, %54, %55 : vector<2x8x8xi1>, vector<2x8x8xf32>
    %cst_17 = arith.constant dense<0xFF800000> : vector<2x8xf32>
    %57 = vector.multi_reduction <maximumf>, %56, %cst_17 [2] : vector<2x8x8xf32> to vector<2x8xf32>
    %58 = vector.shape_cast %57 : vector<2x8xf32> to vector<2x8x1xf32>
    %59 = vector.broadcast %58 : vector<2x8x1xf32> to vector<2x8x8xf32>
    %60 = arith.subf %56, %59 : vector<2x8x8xf32>
    %61 = math.exp %60 : vector<2x8x8xf32>
    %cst_18 = arith.constant dense<0.000000e+00> : vector<2x8xf32>
    %62 = vector.multi_reduction <add>, %61, %cst_18 [2] : vector<2x8x8xf32> to vector<2x8xf32>
    %63 = vector.shape_cast %62 : vector<2x8xf32> to vector<2x8x1xf32>
    %64 = vector.broadcast %63 : vector<2x8x1xf32> to vector<2x8x8xf32>
    %65 = arith.divf %61, %64 : vector<2x8x8xf32>
    "tpu.trace_start"() <{level = 10 : i32, message = "bqk,bkd->bqd"}> : () -> ()
    %cst_19 = arith.constant dense<0.000000e+00> : vector<2x8x8xf32>
    %66 = tpu.matmul %65, %53, %cst_19 {dimension_numbers = #tpu.dot_dimension_numbers<[2], [1], [1], [2], [0, 0, 0, 1, 1, 2], [0], [0]>} : vector<2x8x8xf32>, vector<2x8x8xf32>, vector<2x8x8xf32> -> vector<2x8x8xf32>
    "tpu.trace_stop"() : () -> ()
    %67 = vector.shape_cast %66 : vector<2x8x8xf32> to vector<16x8xf32>
    %68 = vector.extract_strided_slice %4 {offsets = [0, 24], sizes = [16, 8], strides = [1, 1]} : vector<16x96xf32> to vector<16x8xf32>
    %69 = vector.shape_cast %68 : vector<16x8xf32> to vector<2x8x8xf32>
    %70 = vector.extract_strided_slice %4 {offsets = [0, 56], sizes = [16, 8], strides = [1, 1]} : vector<16x96xf32> to vector<16x8xf32>
    %71 = vector.shape_cast %70 : vector<16x8xf32> to vector<2x8x8xf32>
    %72 = vector.extract_strided_slice %4 {offsets = [0, 88], sizes = [16, 8], strides = [1, 1]} : vector<16x96xf32> to vector<16x8xf32>
    %73 = vector.shape_cast %72 : vector<16x8xf32> to vector<2x8x8xf32>
    "tpu.trace_start"() <{level = 10 : i32, message = "bqd,bkd->bqk"}> : () -> ()
    %cst_20 = arith.constant dense<0.000000e+00> : vector<2x8x8xf32>
    %74 = tpu.matmul %69, %71, %cst_20 {dimension_numbers = #tpu.dot_dimension_numbers<[2], [2], [1], [1], [0, 0, 0, 1, 1, 1], [0], [0]>} : vector<2x8x8xf32>, vector<2x8x8xf32>, vector<2x8x8xf32> -> vector<2x8x8xf32>
    %cst_21 = arith.constant -1.000000e+30 : f32
    "tpu.trace_stop"() : () -> ()
    %75 = vector.broadcast %cst_21 : f32 to vector<2x8x8xf32>
    %76 = arith.select %7, %74, %75 : vector<2x8x8xi1>, vector<2x8x8xf32>
    %cst_22 = arith.constant dense<0xFF800000> : vector<2x8xf32>
    %77 = vector.multi_reduction <maximumf>, %76, %cst_22 [2] : vector<2x8x8xf32> to vector<2x8xf32>
    %78 = vector.shape_cast %77 : vector<2x8xf32> to vector<2x8x1xf32>
    %79 = vector.broadcast %78 : vector<2x8x1xf32> to vector<2x8x8xf32>
    %80 = arith.subf %76, %79 : vector<2x8x8xf32>
    %81 = math.exp %80 : vector<2x8x8xf32>
    %cst_23 = arith.constant dense<0.000000e+00> : vector<2x8xf32>
    %82 = vector.multi_reduction <add>, %81, %cst_23 [2] : vector<2x8x8xf32> to vector<2x8xf32>
    %83 = vector.shape_cast %82 : vector<2x8xf32> to vector<2x8x1xf32>
    %84 = vector.broadcast %83 : vector<2x8x1xf32> to vector<2x8x8xf32>
    %85 = arith.divf %81, %84 : vector<2x8x8xf32>
    "tpu.trace_start"() <{level = 10 : i32, message = "bqk,bkd->bqd"}> : () -> ()
    %cst_24 = arith.constant dense<0.000000e+00> : vector<2x8x8xf32>
    %86 = tpu.matmul %85, %73, %cst_24 {dimension_numbers = #tpu.dot_dimension_numbers<[2], [1], [1], [2], [0, 0, 0, 1, 1, 2], [0], [0]>} : vector<2x8x8xf32>, vector<2x8x8xf32>, vector<2x8x8xf32> -> vector<2x8x8xf32>
    "tpu.trace_stop"() : () -> ()
    %87 = vector.shape_cast %86 : vector<2x8x8xf32> to vector<16x8xf32>
    %88 = tpu.concatenate %27, %47, %67, %87 in 1 : vector<16x8xf32>, vector<16x8xf32>, vector<16x8xf32>, vector<16x8xf32> -> vector<16x32xf32>
    %89 = vector.extract_strided_slice %1 {offsets = [0, 96], sizes = [32, 32], strides = [1, 1]} : vector<32x256xf32> to vector<32x32xf32>
    %cst_25 = arith.constant dense<0.000000e+00> : vector<16x32xf32>
    %90 = tpu.matmul %88, %89, %cst_25 {dimension_numbers = #tpu.dot_dimension_numbers<[1], [0], [0], [1], [0, 0, 1, 1], [], []>} : vector<16x32xf32>, vector<32x32xf32>, vector<16x32xf32> -> vector<16x32xf32>
    %91 = vector.extract_strided_slice %2 {offsets = [0, 0], sizes = [1, 32], strides = [1, 1]} : vector<4x32xf32> to vector<1x32xf32>
    %92 = vector.extract_strided_slice %2 {offsets = [1, 0], sizes = [1, 32], strides = [1, 1]} : vector<4x32xf32> to vector<1x32xf32>
    %cst_26 = arith.constant dense<0.000000e+00> : vector<16xf32>
    %93 = vector.multi_reduction <add>, %90, %cst_26 [1] : vector<16x32xf32> to vector<16xf32>
    %94 = vector.shape_cast %93 : vector<16xf32> to vector<16x1xf32>
    %cst_27 = arith.constant 3.200000e+01 : f32
    %95 = vector.broadcast %cst_27 : f32 to vector<16x1xf32>
    %96 = arith.divf %94, %95 : vector<16x1xf32>
    %97 = vector.broadcast %96 : vector<16x1xf32> to vector<16x32xf32>
    %98 = arith.subf %90, %97 : vector<16x32xf32>
    %99 = arith.mulf %98, %98 : vector<16x32xf32>
    %cst_28 = arith.constant dense<0.000000e+00> : vector<16xf32>
    %100 = vector.multi_reduction <add>, %99, %cst_28 [1] : vector<16x32xf32> to vector<16xf32>
    %101 = vector.shape_cast %100 : vector<16xf32> to vector<16x1xf32>
    %cst_29 = arith.constant 3.200000e+01 : f32
    %102 = vector.broadcast %cst_29 : f32 to vector<16x1xf32>
    %103 = arith.divf %101, %102 : vector<16x1xf32>
    %104 = vector.broadcast %96 : vector<16x1xf32> to vector<16x32xf32>
    %105 = arith.subf %90, %104 : vector<16x32xf32>
    %cst_30 = arith.constant 9.99999974E-6 : f32
    %106 = vector.broadcast %cst_30 : f32 to vector<16x1xf32>
    %107 = arith.addf %103, %106 : vector<16x1xf32>
    %108 = math.rsqrt %107 : vector<16x1xf32>
    %109 = vector.broadcast %108 : vector<16x1xf32> to vector<16x32xf32>
    %110 = arith.mulf %105, %109 : vector<16x32xf32>
    %111 = vector.broadcast %91 : vector<1x32xf32> to vector<16x32xf32>
    %112 = arith.mulf %110, %111 : vector<16x32xf32>
    %113 = vector.broadcast %92 : vector<1x32xf32> to vector<16x32xf32>
    %114 = arith.addf %112, %113 : vector<16x32xf32>
    %115 = arith.addf %0, %114 : vector<16x32xf32>
    %116 = vector.extract_strided_slice %1 {offsets = [0, 128], sizes = [32, 128], strides = [1, 1]} : vector<32x256xf32> to vector<32x128xf32>
    %cst_31 = arith.constant dense<0.000000e+00> : vector<16x128xf32>
    %117 = tpu.matmul %115, %116, %cst_31 {dimension_numbers = #tpu.dot_dimension_numbers<[1], [0], [0], [1], [0, 0, 1, 1], [], []>} : vector<16x32xf32>, vector<32x128xf32>, vector<16x128xf32> -> vector<16x128xf32>
    %cst_32 = arith.constant 0.000000e+00 : f32
    %118 = vector.broadcast %cst_32 : f32 to vector<16x128xf32>
    %119 = arith.subf %118, %117 : vector<16x128xf32>
    %120 = math.exp %119 : vector<16x128xf32>
    %cst_33 = arith.constant 1.000000e+00 : f32
    %121 = vector.broadcast %cst_33 : f32 to vector<16x128xf32>
    %122 = arith.addf %121, %120 : vector<16x128xf32>
    %cst_34 = arith.constant 1.000000e+00 : f32
    %123 = vector.broadcast %cst_34 : f32 to vector<16x128xf32>
    %124 = arith.divf %123, %122 : vector<16x128xf32>
    %125 = arith.mulf %117, %124 : vector<16x128xf32>
    %c0_35 = arith.constant 0 : index
    %c0_36 = arith.constant 0 : index
    %126 = vector.load %arg2[%c0_35, %c0_36] : memref<128x32xf32, #tpu.memory_space<vmem>>, vector<128x32xf32>
    %cst_37 = arith.constant dense<0.000000e+00> : vector<16x32xf32>
    %127 = tpu.matmul %125, %126, %cst_37 {dimension_numbers = #tpu.dot_dimension_numbers<[1], [0], [0], [1], [0, 0, 1, 1], [], []>} : vector<16x128xf32>, vector<128x32xf32>, vector<16x32xf32> -> vector<16x32xf32>
    %128 = vector.extract_strided_slice %2 {offsets = [2, 0], sizes = [1, 32], strides = [1, 1]} : vector<4x32xf32> to vector<1x32xf32>
    %129 = vector.extract_strided_slice %2 {offsets = [3, 0], sizes = [1, 32], strides = [1, 1]} : vector<4x32xf32> to vector<1x32xf32>
    %cst_38 = arith.constant dense<0.000000e+00> : vector<16xf32>
    %130 = vector.multi_reduction <add>, %127, %cst_38 [1] : vector<16x32xf32> to vector<16xf32>
    %131 = vector.shape_cast %130 : vector<16xf32> to vector<16x1xf32>
    %cst_39 = arith.constant 3.200000e+01 : f32
    %132 = vector.broadcast %cst_39 : f32 to vector<16x1xf32>
    %133 = arith.divf %131, %132 : vector<16x1xf32>
    %134 = vector.broadcast %133 : vector<16x1xf32> to vector<16x32xf32>
    %135 = arith.subf %127, %134 : vector<16x32xf32>
    %136 = arith.mulf %135, %135 : vector<16x32xf32>
    %cst_40 = arith.constant dense<0.000000e+00> : vector<16xf32>
    %137 = vector.multi_reduction <add>, %136, %cst_40 [1] : vector<16x32xf32> to vector<16xf32>
    %138 = vector.shape_cast %137 : vector<16xf32> to vector<16x1xf32>
    %cst_41 = arith.constant 3.200000e+01 : f32
    %139 = vector.broadcast %cst_41 : f32 to vector<16x1xf32>
    %140 = arith.divf %138, %139 : vector<16x1xf32>
    %141 = vector.broadcast %133 : vector<16x1xf32> to vector<16x32xf32>
    %142 = arith.subf %127, %141 : vector<16x32xf32>
    %cst_42 = arith.constant 9.99999974E-6 : f32
    %143 = vector.broadcast %cst_42 : f32 to vector<16x1xf32>
    %144 = arith.addf %140, %143 : vector<16x1xf32>
    %145 = math.rsqrt %144 : vector<16x1xf32>
    %146 = vector.broadcast %145 : vector<16x1xf32> to vector<16x32xf32>
    %147 = arith.mulf %142, %146 : vector<16x32xf32>
    %148 = vector.broadcast %128 : vector<1x32xf32> to vector<16x32xf32>
    %149 = arith.mulf %147, %148 : vector<16x32xf32>
    %150 = vector.broadcast %129 : vector<1x32xf32> to vector<16x32xf32>
    %151 = arith.addf %149, %150 : vector<16x32xf32>
    %152 = arith.addf %115, %151 : vector<16x32xf32>
    %c0_43 = arith.constant 0 : index
    %c0_44 = arith.constant 0 : index
    %153 = vector.load %arg4[%c0_43, %c0_44] : memref<16x32xf32, #tpu.memory_space<vmem>>, vector<16x32xf32>
    tpu.vector_store %arg4[%c0_43, %c0_44], %152 {strides = array<i32>} : memref<16x32xf32, #tpu.memory_space<vmem>>, vector<16x32xf32>,
    return
  }
}

</mosaic_0001>

<bundles_post_ra>
// kernel: transformer_block.1
= control target key start
LH: loop header
LB: loop body
LE: loop exit
PB: predicated region body
PF: predicated region fallthrough
CT: control target
= control target key end

     0   :  { %vm29_vm0 = vcmask 261120   ;;  %s2538_s0 = inlined_call_operand.vmem [shape: f32[16,32], index: 0, kind: input, shape index: {}]   ;;  %s2539_s1 = inlined_call_operand.vmem [shape: f32[32,256], index: 1, kind: input, shape index: {}]   ;;  %s2540_s2 = inlined_call_operand.vmem [shape: f32[128,32], index: 2, kind: input, shape index: {}]   ;;  %s2541_s3 = inlined_call_operand.vmem [shape: f32[4,32], index: 3, kind: input, shape index: {}]   ;;  %s2542_s4 = inlined_call_operand.hbm [shape: f32[16,32], index: 4, kind: output, shape index: {}]  }
   0x1   :  { %v2239_v0 = vld [vmem:[%s2539_s1 + $0x30] sm:$0xff]  ;;  %v2244_v1 = vld [vmem:[%s2539_s1 + $0x20] sm:$0xff] }
   0x2   :  { %1955 = vmatprep.subr.mxu1 %v2239_v0  ;;  %v2250_v2 = vld [vmem:[%s2538_s0] sm:$0xff]  ;;  %v2256_v3 = vld [vmem:[%s2539_s1 + $0x10] sm:$0xff] }
   0x3   :  { %1956 = vmatpush3.msra.mxu1 %v2239_v0  ;;  %1963 = vmatprep.mubr.msk.f32.mxu1 %vm29_vm0, %v2250_v2 }
   0x4   :  { %9 = vsyncpa [#allocation3], 0  ;;  %1957 = vmatprep.subr.mxu1 %v2244_v1  ;;  %v2265_v4 = vld [vmem:[%s2539_s1] sm:$0xff]  ;;  %v2272_v5 = vld [vmem:[%s2538_s0 + $0x8] sm:$0xff]  ;;  %v2192_v6 = vmov 0.0   ;;  %vm2193_vm1 = vmmov 0   ;;  %v111_v11 = vlaneseq }
   0x5   :  { %1958 = vmatpush3.msra.mxu1 %v2244_v1  ;;  %1976 = vmatprep.subr.mxu0 %v2192_v6  ;;  %s2194_s0 = smov 96   ;;  %vm119_vm2 = vcmask 64512   ;;  %s2195_s27 = smov 64   ;;  %vm1469_vm4 = vcmask 130048   ;;  %vm1472_vm5 = vcmask 195584  }
   0x6   :  { %1959 = vmatprep.subr.mxu1 %v2256_v3  ;;  %1978 = vmatprep.mubr.msk.f32.mxu0 %vm2193_vm1, %v2192_v6  ;;  %v2302_v12 = vshrl.u32 %v111_v11, 7  ;;  %v114_v13 = vand.u32 127, %v111_v11  ;;  %s2196_s28 = smov 88   ;;  %s2197_s29 = smov 120  }
   0x7   :  { %1960 = vmatpush3.msra.mxu1 %v2256_v3  ;;  %s2198_s30 = smov 56   ;;  %s2199_s5 = smov 80  }
   0x8   :  { %1961 = vmatprep.subr.mxu1 %v2265_v4  ;;  %vm2305_vm3 = vcmp.le.s32.totalorder %v114_v13, %v2302_v12  ;;  %s2200_s6 = smov 112   ;;  %s2201_s7 = smov 48  }
   0x9   :  { %1962 = vmatpush3.msra.mxu1 %v2265_v4  ;;  %s2202_s8 = smov 72   ;;  %s2203_s9 = smov 104  }
   0xa   :  { %1964 = vmatmul.mubr.msk.f32.vlgmr.msra.gmra.mxu1 %vm29_vm0, %v2272_v5  ;;  %1966 = vmatprep.subr.mxu1 %v2192_v6  ;;  %s2204_s10 = smov 40   ;;  %s2205_s11 = smov 32  }
   0xb   :  { %1968 = vmatprep.mubr.msk.f32.mxu1 %vm2193_vm1, %v2192_v6  ;;  %s2206_s12 = smov 16   ;;  %s2207_s13 = smov 8  }
   0xc   :  { %s2208_s14 = smov 24  }
  0xca   :  { %v2284_v7 = vpop.f32.mrf.mxu1 }
  0xcc   :  { %v2286_v8 = vpop.f32.mrf.mxu1 }
  0xcd   :  { %117 = vrot.lane.b32.xlu0 %v2286_v8, %s2194_s0 }
  0xd1   :  { %195 = vrot.lane.b32.xlu0 %v2284_v7, %s2194_s0 }
 0x13f   :  { %v118_v9 = vpop.permute.xlu0 %117 }
 0x140   :  { %1967 = vmatpush3.xpose.msk.msra.mxu1 %vm119_vm2, %v118_v9 }
 0x141   :  { %1971 = vmatprep.subr.mxu1 %v2192_v6 }
 0x143   :  { %1969 = vmatmul.mubr.msk.f32.vlgmr.msra.gmra.mxu1 %vm119_vm2, %v2286_v8  ;;  %v196_v10 = vpop.permute.xlu0 %195 }
 0x144   :  { %1972 = vmatpush3.xpose.msk.msra.mxu1 %vm119_vm2, %v196_v10  ;;  %1973 = vmatprep.mubr.msk.f32.mxu1 %vm2193_vm1, %v2192_v6 }
 0x145   :  { %1981 = vmatprep.subr.mxu1 %v2192_v6 }
 0x147   :  { %1974 = vmatmul.mubr.msk.f32.vlgmr.msra.gmra.mxu1 %vm119_vm2, %v2284_v7 }
 0x148   :  { %1983 = vmatprep.mubr.msk.f32.mxu1 %vm2193_vm1, %v2192_v6 }
 0x203   :  { %v190_v15 = vpop.f32.mrf.mxu1 }
 0x204   :  { %v271_v16 = vsel %vm2305_vm3, %v190_v15, -1e+30 }
 0x205   :  { %v1970_v17 = vpop.f32.mrf.mxu1  ;;  %v273_v18 = vsel %vm119_vm2, %v271_v16, -inf }
 0x206   :  { %274 = vmax.xlane.f32.xlu1 %v273_v18 }
 0x207   :  { %v267_v19 = vpop.f32.mrf.mxu1 }
 0x208   :  { %v272_v20 = vsel %vm2305_vm3, %v267_v19, -1e+30 }
 0x209   :  { %v1975_v21 = vpop.f32.mrf.mxu1  ;;  %v276_v22 = vsel %vm119_vm2, %v272_v20, -inf }
 0x20a   :  { %277 = vmax.xlane.f32.xlu1 %v276_v22 }
 0x21b   :  { %295 = vrot.lane.b32.xlu1 %v2286_v8, %s2195_s27 }
 0x21f   :  { %371 = vrot.lane.b32.xlu1 %v2284_v7, %s2195_s27 }
 0x223   :  { %449 = vrot.lane.b32.xlu1 %v2286_v8, %s2196_s28 }
 0x227   :  { %527 = vrot.lane.b32.xlu1 %v2284_v7, %s2196_s28 }
 0x28f   :  { %v275_v23 = vpop.xlane.xlu1 %274 }
 0x290   :  { %v279_v24 = vsub.f32 %v271_v16, %v275_v23 }
 0x292   :  { %v281_v25 = vmul.f32 1.442695, %v279_v24 }
 0x293   :  { %v278_v26 = vpop.xlane.xlu1 %277 }
 0x294   :  { %2122 = vpow2.f32 %v281_v25  ;;  %v280_v27 = vsub.f32 %v272_v20, %v278_v26 }
 0x296   :  { %v283_v28 = vmul.f32 1.442695, %v280_v27 }
 0x297   :  { %v296_v29 = vpop.permute.xlu1 %295 }
 0x298   :  { %2124 = vpow2.f32 %v283_v28  ;;  %1977 = vmatpush3.msra.mxu0 %v296_v29 }
 0x299   :  { %1986 = vmatprep.subr.mxu0 %v2192_v6 }
 0x29b   :  { %v372_v30 = vpop.permute.xlu1 %371 }
 0x29c   :  { %1982 = vmatpush3.msra.mxu1 %v372_v30 }
 0x29d   :  { %1991 = vmatprep.subr.mxu1 %v2192_v6 }
 0x29f   :  { %v450_v35 = vpop.permute.xlu1 %449 }
 0x2a1   :  { %v2123_v31 = vpop.eup %2122 }
 0x2a2   :  { %v285_v32 = vsel %vm119_vm2, %v2123_v31, 0.0 }
 0x2a3   :  { %286 = vadd.xlane.f32.xlu0 %v285_v32  ;;  %v528_v36 = vpop.permute.xlu1 %527 }
 0x2a5   :  { %v2125_v33 = vpop.eup %2124 }
 0x2a6   :  { %v288_v34 = vsel %vm119_vm2, %v2125_v33, 0.0 }
 0x2a7   :  { %289 = vadd.xlane.f32.xlu1 %v288_v34 }
 0x2b8   :  { %525 = vrot.lane.b32.xlu1 %v2284_v7, %s2197_s29 }
 0x2b9   :  { %447 = vrot.lane.b32.xlu0 %v2286_v8, %s2197_s29 }
 0x32c   :  { %v287_v37 = vpop.xlane.xlu0 %286 }
 0x32d   :  { %2126 = vrcp.f32 %v287_v37 }
 0x330   :  { %v290_v38 = vpop.xlane.xlu1 %289  ;;  %v448_v43 = vpop.permute.xlu0 %447 }
 0x331   :  { %2128 = vrcp.f32 %v290_v38 }
 0x334   :  { %v526_v44 = vpop.permute.xlu1 %525 }
 0x33a   :  { %v2127_v39 = vpop.eup %2126 }
 0x33b   :  { %v292_v40 = vmul.f32 %v2127_v39, %v2123_v31 }
 0x33d   :  { %1979 = vmatmul.mubr.msk.f32.vlgmr.msra.gmra.mxu0 %vm119_vm2, %v292_v40 }
 0x33e   :  { %v2129_v41 = vpop.eup %2128  ;;  %1987 = vmatpush3.xpose.msk.msra.mxu0 %vm119_vm2, %v450_v35  ;;  %1988 = vmatprep.mubr.msk.f32.mxu0 %vm2193_vm1, %v2192_v6 }
 0x33f   :  { %v294_v42 = vmul.f32 %v2129_v41, %v2125_v33  ;;  %1996 = vmatprep.subr.mxu0 %v2192_v6 }
 0x341   :  { %1984 = vmatmul.mubr.msk.f32.vlgmr.msra.gmra.mxu1 %vm119_vm2, %v294_v42  ;;  %1989 = vmatmul.mubr.msk.f32.vlgmr.msra.gmra.mxu0 %vm119_vm2, %v448_v43 }
 0x342   :  { %1992 = vmatpush3.xpose.msk.msra.mxu1 %vm119_vm2, %v528_v36  ;;  %1993 = vmatprep.mubr.msk.f32.mxu1 %vm2193_vm1, %v2192_v6 }
 0x343   :  { %2001 = vmatprep.subr.mxu1 %v2192_v6  ;;  %1998 = vmatprep.mubr.msk.f32.mxu0 %vm2193_vm1, %v2192_v6 }
 0x345   :  { %1994 = vmatmul.mubr.msk.f32.vlgmr.msra.gmra.mxu1 %vm119_vm2, %v526_v44 }
 0x346   :  { %2003 = vmatprep.mubr.msk.f32.mxu1 %vm2193_vm1, %v2192_v6 }
 0x3fd   :  { %v2341_v45 = vpop.f32.mrf.mxu0 }
 0x3ff   :  { %v1980_v46 = vpop.f32.mrf.mxu0 }
 0x401   :  { %v2343_v47 = vpop.f32.mrf.mxu1  ;;  %v521_v48 = vpop.f32.mrf.mxu0 }
 0x402   :  { %v603_v49 = vsel %vm2305_vm3, %v521_v48, -1e+30 }
 0x403   :  { %v1985_v50 = vpop.f32.mrf.mxu1  ;;  %v1990_v51 = vpop.f32.mrf.mxu0  ;;  %v605_v52 = vsel %vm119_vm2, %v603_v49, -inf }
 0x404   :  { %606 = vmax.xlane.f32.xlu1 %v605_v52 }
 0x405   :  { %v599_v53 = vpop.f32.mrf.mxu1 }
 0x406   :  { %v604_v54 = vsel %vm2305_vm3, %v599_v53, -1e+30 }
 0x407   :  { %v1995_v55 = vpop.f32.mrf.mxu1  ;;  %v608_v56 = vsel %vm119_vm2, %v604_v54, -inf }
 0x408   :  { %609 = vmax.xlane.f32.xlu0 %v608_v56 }
 0x415   :  { %627 = vrot.lane.b32.xlu1 %v2286_v8, %s2198_s30 }
 0x419   :  { %781 = vrot.lane.b32.xlu1 %v2286_v8, %s2199_s5 }
 0x41d   :  { %859 = vrot.lane.b32.xlu1 %v2284_v7, %s2199_s5 }
 0x41e   :  { %703 = vrot.lane.b32.xlu0 %v2284_v7, %s2198_s30 }
 0x422   :  { %779 = vrot.lane.b32.xlu0 %v2286_v8, %s2200_s6 }
 0x48d   :  { %v607_v57 = vpop.xlane.xlu1 %606 }
 0x48e   :  { %v611_v58 = vsub.f32 %v603_v49, %v607_v57 }
 0x490   :  { %v613_v59 = vmul.f32 1.442695, %v611_v58 }
 0x491   :  { %v628_v60 = vpop.permute.xlu1 %627  ;;  %v610_v61 = vpop.xlane.xlu0 %609 }
 0x492   :  { %2130 = vpow2.f32 %v613_v59  ;;  %v612_v62 = vsub.f32 %v604_v54, %v610_v61  ;;  %1997 = vmatpush3.msra.mxu0 %v628_v60 }
 0x493   :  { %2006 = vmatprep.subr.mxu0 %v2192_v6 }
 0x494   :  { %v615_v63 = vmul.f32 1.442695, %v612_v62 }
 0x495   :  { %v704_v9 = vpop.permute.xlu0 %703  ;;  %v782_v16 = vpop.permute.xlu1 %781 }
 0x496   :  { %2132 = vpow2.f32 %v615_v63  ;;  %2002 = vmatpush3.msra.mxu1 %v704_v9 }
 0x497   :  { %2011 = vmatprep.subr.mxu1 %v2192_v6 }
 0x499   :  { %v860_v17 = vpop.permute.xlu1 %859  ;;  %v780_v24 = vpop.permute.xlu0 %779 }
 0x49f   :  { %v2131_v10 = vpop.eup %2130 }
 0x4a0   :  { %v617_v11 = vsel %vm119_vm2, %v2131_v10, 0.0 }
 0x4a1   :  { %618 = vadd.xlane.f32.xlu1 %v617_v11 }
 0x4a3   :  { %v2133_v13 = vpop.eup %2132 }
 0x4a4   :  { %v620_v15 = vsel %vm119_vm2, %v2133_v13, 0.0 }
 0x4a5   :  { %621 = vadd.xlane.f32.xlu1 %v620_v15 }
 0x4b6   :  { %857 = vrot.lane.b32.xlu1 %v2284_v7, %s2200_s6 }
 0x52a   :  { %v619_v18 = vpop.xlane.xlu1 %618 }
 0x52b   :  { %2134 = vrcp.f32 %v619_v18 }
 0x52e   :  { %v622_v19 = vpop.xlane.xlu1 %621 }
 0x52f   :  { %2136 = vrcp.f32 %v622_v19 }
 0x532   :  { %v858_v25 = vpop.permute.xlu1 %857 }
 0x538   :  { %v2135_v20 = vpop.eup %2134 }
 0x539   :  { %v624_v21 = vmul.f32 %v2135_v20, %v2131_v10 }
 0x53b   :  { %1999 = vmatmul.mubr.msk.f32.vlgmr.msra.gmra.mxu0 %vm119_vm2, %v624_v21 }
 0x53c   :  { %v2137_v22 = vpop.eup %2136  ;;  %2007 = vmatpush3.xpose.msk.msra.mxu0 %vm119_vm2, %v782_v16  ;;  %2008 = vmatprep.mubr.msk.f32.mxu0 %vm2193_vm1, %v2192_v6 }
 0x53d   :  { %v626_v23 = vmul.f32 %v2137_v22, %v2133_v13  ;;  %2016 = vmatprep.subr.mxu0 %v2192_v6 }
 0x53f   :  { %2004 = vmatmul.mubr.msk.f32.vlgmr.msra.gmra.mxu1 %vm119_vm2, %v626_v23  ;;  %2009 = vmatmul.mubr.msk.f32.vlgmr.msra.gmra.mxu0 %vm119_vm2, %v780_v24 }
 0x540   :  { %2012 = vmatpush3.xpose.msk.msra.mxu1 %vm119_vm2, %v860_v17  ;;  %2013 = vmatprep.mubr.msk.f32.mxu1 %vm2193_vm1, %v2192_v6 }
 0x541   :  { %2021 = vmatprep.subr.mxu1 %v2192_v6  ;;  %2018 = vmatprep.mubr.msk.f32.mxu0 %vm2193_vm1, %v2192_v6 }
 0x543   :  { %2014 = vmatmul.mubr.msk.f32.vlgmr.msra.gmra.mxu1 %vm119_vm2, %v858_v25 }
 0x544   :  { %2023 = vmatprep.mubr.msk.f32.mxu1 %vm2193_vm1, %v2192_v6 }
 0x5fb   :  { %v2377_v26 = vpop.f32.mrf.mxu0 }
 0x5fd   :  { %v2000_v27 = vpop.f32.mrf.mxu0 }
 0x5ff   :  { %v2379_v28 = vpop.f32.mrf.mxu1  ;;  %v853_v29 = vpop.f32.mrf.mxu0 }
 0x600   :  { %v935_v30 = vsel %vm2305_vm3, %v853_v29, -1e+30 }
 0x601   :  { %v2005_v31 = vpop.f32.mrf.mxu1  ;;  %v2010_v32 = vpop.f32.mrf.mxu0  ;;  %v937_v33 = vsel %vm119_vm2, %v935_v30, -inf }
 0x602   :  { %938 = vmax.xlane.f32.xlu0 %v937_v33 }
 0x603   :  { %v931_v34 = vpop.f32.mrf.mxu1 }
 0x604   :  { %v936_v35 = vsel %vm2305_vm3, %v931_v34, -1e+30 }
 0x605   :  { %v2015_v36 = vpop.f32.mrf.mxu1  ;;  %v940_v37 = vsel %vm119_vm2, %v936_v35, -inf }
 0x606   :  { %941 = vmax.xlane.f32.xlu1 %v940_v37 }
 0x617   :  { %959 = vrot.lane.b32.xlu1 %v2286_v8, %s2201_s7 }
 0x618   :  { %1035 = vrot.lane.b32.xlu0 %v2284_v7, %s2201_s7 }
 0x61b   :  { %1113 = vrot.lane.b32.xlu1 %v2286_v8, %s2202_s8 }
 0x61f   :  { %1191 = vrot.lane.b32.xlu1 %v2284_v7, %s2202_s8 }
 0x623   :  { %1189 = vrot.lane.b32.xlu1 %v2284_v7, %s2203_s9 }
 0x68b   :  { %v939_v38 = vpop.xlane.xlu0 %938 }
 0x68c   :  { %v943_v39 = vsub.f32 %v935_v30, %v939_v38 }
 0x68e   :  { %v945_v40 = vmul.f32 1.442695, %v943_v39 }
 0x68f   :  { %v942_v41 = vpop.xlane.xlu1 %941  ;;  %v1036_v42 = vpop.permute.xlu0 %1035 }
 0x690   :  { %2138 = vpow2.f32 %v945_v40  ;;  %v944_v43 = vsub.f32 %v936_v35, %v942_v41  ;;  %2022 = vmatpush3.msra.mxu1 %v1036_v42 }
 0x691   :  { %2031 = vmatprep.subr.mxu1 %v2192_v6 }
 0x692   :  { %v947_v44 = vmul.f32 1.442695, %v944_v43 }
 0x693   :  { %v960_v46 = vpop.permute.xlu1 %959 }
 0x694   :  { %2140 = vpow2.f32 %v947_v44  ;;  %2017 = vmatpush3.msra.mxu0 %v960_v46 }
 0x695   :  { %2026 = vmatprep.subr.mxu0 %v2192_v6 }
 0x697   :  { %v1114_v54 = vpop.permute.xlu1 %1113 }
 0x69b   :  { %v1192_v58 = vpop.permute.xlu1 %1191 }
 0x69d   :  { %v2139_v48 = vpop.eup %2138 }
 0x69e   :  { %v949_v49 = vsel %vm119_vm2, %v2139_v48, 0.0 }
 0x69f   :  { %950 = vadd.xlane.f32.xlu0 %v949_v49  ;;  %v1190_v61 = vpop.permute.xlu1 %1189 }
 0x6a1   :  { %v2141_v50 = vpop.eup %2140 }
 0x6a2   :  { %v952_v51 = vsel %vm119_vm2, %v2141_v50, 0.0 }
 0x6a3   :  { %953 = vadd.xlane.f32.xlu0 %v952_v51 }
 0x6b9   :  { %1111 = vrot.lane.b32.xlu0 %v2286_v8, %s2203_s9 }
 0x728   :  { %v951_v52 = vpop.xlane.xlu0 %950 }
 0x729   :  { %2142 = vrcp.f32 %v951_v52 }
 0x72c   :  { %v954_v53 = vpop.xlane.xlu0 %953 }
 0x72d   :  { %2144 = vrcp.f32 %v954_v53 }
 0x730   :  { %v1112_v60 = vpop.permute.xlu0 %1111 }
 0x736   :  { %v2143_v55 = vpop.eup %2142 }
 0x737   :  { %v956_v56 = vmul.f32 %v2143_v55, %v2139_v48 }
 0x739   :  { %2019 = vmatmul.mubr.msk.f32.vlgmr.msra.gmra.mxu0 %vm119_vm2, %v956_v56 }
 0x73a   :  { %v2145_v57 = vpop.eup %2144  ;;  %2027 = vmatpush3.xpose.msk.msra.mxu0 %vm119_vm2, %v1114_v54  ;;  %2028 = vmatprep.mubr.msk.f32.mxu0 %vm2193_vm1, %v2192_v6 }
 0x73b   :  { %v958_v59 = vmul.f32 %v2145_v57, %v2141_v50  ;;  %2036 = vmatprep.subr.mxu0 %v2192_v6 }
 0x73d   :  { %2024 = vmatmul.mubr.msk.f32.vlgmr.msra.gmra.mxu1 %vm119_vm2, %v958_v59  ;;  %2029 = vmatmul.mubr.msk.f32.vlgmr.msra.gmra.mxu0 %vm119_vm2, %v1112_v60 }
 0x73e   :  { %2032 = vmatpush3.xpose.msk.msra.mxu1 %vm119_vm2, %v1192_v58  ;;  %2033 = vmatprep.mubr.msk.f32.mxu1 %vm2193_vm1, %v2192_v6 }
 0x73f   :  { %2041 = vmatprep.subr.mxu1 %v2192_v6  ;;  %2038 = vmatprep.mubr.msk.f32.mxu0 %vm2193_vm1, %v2192_v6 }
 0x741   :  { %2034 = vmatmul.mubr.msk.f32.vlgmr.msra.gmra.mxu1 %vm119_vm2, %v1190_v61 }
 0x742   :  { %2043 = vmatprep.mubr.msk.f32.mxu1 %vm2193_vm1, %v2192_v6 }
 0x7f9   :  { %v1031_v62 = vpop.f32.mrf.mxu0 }
 0x7fb   :  { %v2020_v63 = vpop.f32.mrf.mxu0 }
 0x7fd   :  { %v1107_v9 = vpop.f32.mrf.mxu1  ;;  %v1185_v10 = vpop.f32.mrf.mxu0 }
 0x7fe   :  { %v1267_v11 = vsel %vm2305_vm3, %v1185_v10, -1e+30  ;;  %v27_v10 = vld [vmem:[%s2539_s1 + $0x38] sm:$0xff] }
 0x7ff   :  { %v2025_v13 = vpop.f32.mrf.mxu1  ;;  %v2030_v15 = vpop.f32.mrf.mxu0  ;;  %v1269_v16 = vsel %vm119_vm2, %v1267_v11, -inf }
 0x800   :  { %1270 = vmax.xlane.f32.xlu0 %v1269_v16  ;;  %v23_v13 = vld [vmem:[%s2539_s1 + $0x18] sm:$0xff]  ;;  %v21_v15 = vld [vmem:[%s2539_s1 + $0x8] sm:$0xff] }
 0x801   :  { %v1263_v17 = vpop.f32.mrf.mxu1 }
 0x802   :  { %v1268_v18 = vsel %vm2305_vm3, %v1263_v17, -1e+30 }
 0x803   :  { %v2035_v19 = vpop.f32.mrf.mxu1  ;;  %v1272_v20 = vsel %vm119_vm2, %v1268_v18, -inf }
 0x804   :  { %1273 = vmax.xlane.f32.xlu1 %v1272_v20 }
 0x815   :  { %1291 = vrot.lane.b32.xlu1 %v2286_v8, %s2204_s10 }
 0x819   :  { %1485 = vrot.lane.b32.xlu1 %v2239_v0, %s2205_s11 }
 0x81d   :  { %1483 = vrot.lane.b32.xlu1 %v2244_v1, %s2205_s11 }
 0x821   :  { %1481 = vrot.lane.b32.xlu1 %v2256_v3, %s2205_s11 }
 0x825   :  { %1453 = vrot.lane.b32.xlu1 %v1031_v62, %s2206_s12 }
 0x889   :  { %v1271_v6 = vpop.xlane.xlu0 %1270 }
 0x88a   :  { %v1275_v21 = vsub.f32 %v1267_v11, %v1271_v6  ;;  %v25_v11 = vld [vmem:[%s2539_s1 + $0x28] sm:$0xff] }
 0x88c   :  { %v1277_v14 = vmul.f32 1.442695, %v1275_v21  ;;  %v1601_v21 = vsub.s32 0, %v2302_v12 }
 0x88d   :  { %v1274_v22 = vpop.xlane.xlu1 %1273 }
 0x88e   :  { %2146 = vpow2.f32 %v1277_v14  ;;  %v1276_v23 = vsub.f32 %v1268_v18, %v1274_v22  ;;  %v2459_v14 = vld [vmem:[%s2541_s3] sm:$0xf]  ;;  %v1607_v22 = vsub.s32 1, %v2302_v12 }
 0x890   :  { %v1279_v24 = vmul.f32 1.442695, %v1276_v23  ;;  %v1602_v23 = vrot.slane %v2459_v14, %v1601_v21 }
 0x891   :  { %v1292_v25 = vpop.permute.xlu1 %1291 }
 0x892   :  { %2148 = vpow2.f32 %v1279_v24  ;;  %2037 = vmatpush3.msra.mxu0 %v1292_v25 }
 0x895   :  { %v1486_v31 = vpop.permute.xlu1 %1485 }
 0x89b   :  { %v2147_v8 = vpop.eup %2146 }
 0x89c   :  { %v1281_v27 = vsel %vm119_vm2, %v2147_v8, 0.0 }
 0x89d   :  { %1282 = vadd.xlane.f32.xlu0 %v1281_v27 }
 0x89f   :  { %v2149_v0 = vpop.eup %2148 }
 0x8a0   :  { %v1284_v1 = vsel %vm119_vm2, %v2149_v0, 0.0 }
 0x8a1   :  { %1285 = vadd.xlane.f32.xlu0 %v1284_v1 }
 0x8b7   :  { %1367 = vrot.lane.b32.xlu0 %v2284_v7, %s2204_s10 }
 0x8bb   :  { %1445 = vrot.lane.b32.xlu0 %v2377_v26, %s2207_s13  ;;  %v1484_v26 = vpop.permute.xlu1 %1483 }
 0x8bf   :  { %1447 = vrot.lane.b32.xlu0 %v2379_v28, %s2207_s13 }
 0x8c3   :  { %1455 = vrot.lane.b32.xlu0 %v1107_v9, %s2206_s12 }
 0x8c7   :  { %1479 = vrot.lane.b32.xlu0 %v2265_v4, %s2205_s11  ;;  %v1482_v4 = vpop.permute.xlu1 %1481 }
 0x8cb   :  { %v1454_v42 = vpop.permute.xlu1 %1453 }
 0x926   :  { %v1283_v3 = vpop.xlane.xlu0 %1282 }
 0x927   :  { %2150 = vrcp.f32 %v1283_v3 }
 0x92a   :  { %v1286_v29 = vpop.xlane.xlu0 %1285 }
 0x92b   :  { %2152 = vrcp.f32 %v1286_v29 }
 0x92e   :  { %v1368_v30 = vpop.permute.xlu0 %1367 }
 0x92f   :  { %2042 = vmatpush3.msra.mxu1 %v1368_v30 }
 0x930   :  { %2046 = vmatprep.subr.mxu1 %v1486_v31 }
 0x932   :  { %v1446_v28 = vpop.permute.xlu0 %1445 }
 0x933   :  { %v1467_v43 = vsel %vm119_vm2, %v2341_v45, %v1446_v28  ;;  %v1716_v28 = vld [vmem:[%s2540_s2 + $0x40] sm:$0xff] }
 0x934   :  { %v2151_v32 = vpop.eup %2150  ;;  %v1470_v44 = vsel %vm1469_vm4, %v1467_v43, %v1454_v42  ;;  %v1708_v42 = vld [vmem:[%s2540_s2] sm:$0xff] }
 0x935   :  { %v1288_v7 = vmul.f32 %v2151_v32, %v2147_v8  ;;  %v1608_v8 = vrot.slane %v2459_v14, %v1607_v22 }
 0x936   :  { %v1448_v35 = vpop.permute.xlu0 %1447 }
 0x937   :  { %2039 = vmatmul.mubr.msk.f32.vlgmr.msra.gmra.mxu0 %vm119_vm2, %v1288_v7  ;;  %v1468_v49 = vsel %vm119_vm2, %v2343_v47, %v1448_v35  ;;  %v1723_v7 = vld [vmem:[%s2540_s2 + $0x78] sm:$0xff] }
 0x938   :  { %v2153_v33 = vpop.eup %2152  ;;  %2068 = vmatprep.subr.mxu0 %v1723_v7  ;;  %v1715_v35 = vld [vmem:[%s2540_s2 + $0x38] sm:$0xff] }
 0x939   :  { %v1290_v34 = vmul.f32 %v2153_v33, %v2149_v0  ;;  %2069 = vmatpush3.msra.mxu0 %v1723_v7  ;;  %v1720_v33 = vld [vmem:[%s2540_s2 + $0x60] sm:$0xff] }
 0x93a   :  { %v1456_v36 = vpop.permute.xlu0 %1455 }
 0x93b   :  { %2044 = vmatmul.mubr.msk.f32.vlgmr.msra.gmra.mxu1 %vm119_vm2, %v1290_v34  ;;  %v1471_v50 = vsel %vm1469_vm4, %v1468_v49, %v1456_v36  ;;  %v1718_v34 = vld [vmem:[%s2540_s2 + $0x50] sm:$0xff] }
 0x93c   :  { %2047 = vmatpush3.msra.mxu1 %v1486_v31  ;;  %v1714_v36 = vld [vmem:[%s2540_s2 + $0x30] sm:$0xff] }
 0x93d   :  { %2048 = vmatprep.subr.mxu1 %v1484_v26 }
 0x93e   :  { %2049 = vmatpush3.msra.mxu1 %v1484_v26  ;;  %v1480_v37 = vpop.permute.xlu0 %1479  ;;  %v1719_v26 = vld [vmem:[%s2540_s2 + $0x58] sm:$0xff] }
 0x93f   :  { %2050 = vmatprep.subr.mxu1 %v1482_v4 }
 0x940   :  { %2051 = vmatpush3.msra.mxu1 %v1482_v4  ;;  %v1717_v4 = vld [vmem:[%s2540_s2 + $0x48] sm:$0xff] }
 0x941   :  { %2052 = vmatprep.subr.mxu1 %v1480_v37 }
 0x942   :  { %2053 = vmatpush3.msra.mxu1 %v1480_v37  ;;  %v1713_v37 = vld [vmem:[%s2540_s2 + $0x28] sm:$0xff] }
 0x943   :  { %2057 = vmatprep.subr.mxu1 %v27_v10 }
 0x9f7   :  { %v1363_v38 = vpop.f32.mrf.mxu0 }
 0x9f8   :  { %1461 = vrot.lane.b32.xlu1 %v1363_v38, %s2208_s14  ;;  %v1712_v38 = vld [vmem:[%s2540_s2 + $0x20] sm:$0xff] }
 0x9f9   :  { %v2040_v39 = vpop.f32.mrf.mxu0 }
 0x9fa   :  { %v1711_v39 = vld [vmem:[%s2540_s2 + $0x18] sm:$0xff] }
 0x9fb   :  { %v1439_v40 = vpop.f32.mrf.mxu1 }
 0x9fc   :  { %1463 = vrot.lane.b32.xlu1 %v1439_v40, %s2208_s14  ;;  %v1710_v40 = vld [vmem:[%s2540_s2 + $0x10] sm:$0xff] }
 0x9fd   :  { %v2045_v41 = vpop.f32.mrf.mxu1 }
 0x9fe   :  { %v1709_v41 = vld [vmem:[%s2540_s2 + $0x8] sm:$0xff] }
 0xa6a   :  { %v1462_v46 = vpop.permute.xlu1 %1461 }
 0xa6b   :  { %v1473_v48 = vsel %vm1472_vm5, %v1470_v44, %v1462_v46 }
 0xa6c   :  { %2054 = vmatprep.mubr.msk.f32.mxu1 %vm29_vm0, %v1473_v48 }
 0xa6e   :  { %v1464_v51 = vpop.permute.xlu1 %1463 }
 0xa6f   :  { %v1474_v52 = vsel %vm1472_vm5, %v1471_v50, %v1464_v51 }
 0xa70   :  { %2055 = vmatmul.mubr.msk.f32.vlgmr.msra.gmra.mxu1 %vm29_vm0, %v1474_v52 }
 0xa71   :  { %2058 = vmatpush3.msra.mxu1 %v27_v10 }
 0xa72   :  { %2059 = vmatprep.subr.mxu1 %v25_v11 }
 0xa73   :  { %2060 = vmatpush3.msra.mxu1 %v25_v11 }
 0xa74   :  { %2061 = vmatprep.subr.mxu1 %v23_v13 }
 0xa75   :  { %2062 = vmatpush3.msra.mxu1 %v23_v13 }
 0xa76   :  { %2063 = vmatprep.subr.mxu1 %v21_v15 }
 0xa77   :  { %2064 = vmatpush3.msra.mxu1 %v21_v15 }
 0xb30   :  { %v2056_v53 = vpop.f32.mrf.mxu1 }
 0xb31   :  { %v1575_v54 = vsel %vm29_vm0, %v2056_v53, 0.0 }
 0xb32   :  { %1576 = vadd.xlane.f32.xlu1 %v1575_v54  ;;  %v1563_v45 = vpop.f32.mrf.mxu1 }
 0xb33   :  { %v1572_v55 = vsel %vm29_vm0, %v1563_v45, 0.0 }
 0xb34   :  { %1573 = vadd.xlane.f32.xlu0 %v1572_v55 }
 0xbbb   :  { %v1577_v56 = vpop.xlane.xlu1 %1576 }
 0xbbc   :  { %v1580_v57 = vmul.f32 0.03125, %v1577_v56 }
 0xbbd   :  { %v1574_v58 = vpop.xlane.xlu0 %1573 }
 0xbbe   :  { %v1579_v59 = vmul.f32 0.03125, %v1574_v58  ;;  %v1582_v60 = vsub.f32 %v2056_v53, %v1580_v57 }
 0xbc0   :  { %v1581_v61 = vsub.f32 %v1563_v45, %v1579_v59  ;;  %v1584_v63 = vmul.f32 %v1582_v60, %v1582_v60 }
 0xbc2   :  { %v1583_v47 = vmul.f32 %v1581_v61, %v1581_v61  ;;  %v1588_v9 = vsel %vm29_vm0, %v1584_v63, 0.0 }
 0xbc4   :  { %v1585_v62 = vsel %vm29_vm0, %v1583_v47, 0.0 }
 0xbc5   :  { %1586 = vadd.xlane.f32.xlu0 %v1585_v62 }
 0xbc9   :  { %1589 = vadd.xlane.f32.xlu0 %v1588_v9 }
 0xc4e   :  { %v1587_v16 = vpop.xlane.xlu0 %1586 }
 0xc4f   :  { %v1591_v17 = vmul.f32 0.03125, %v1587_v16 }
 0xc51   :  { %v1593_v18 = vadd.f32 1e-05, %v1591_v17 }
 0xc52   :  { %v1590_v19 = vpop.xlane.xlu0 %1589 }
 0xc53   :  { %2154 = vrsqrt.f32 %v1593_v18  ;;  %v1592_v20 = vmul.f32 0.03125, %v1590_v19 }
 0xc55   :  { %v1594_v6 = vadd.f32 1e-05, %v1592_v20 }
 0xc57   :  { %2156 = vrsqrt.f32 %v1594_v6 }
 0xc60   :  { %v2155_v24 = vpop.eup %2154 }
 0xc61   :  { %v1597_v25 = vmul.f32 %v2155_v24, %v1581_v61  ;;  %v1833_v24 = vsub.s32 3, %v2302_v12 }
 0xc63   :  { %v1603_v27 = vmul.f32 %v1602_v23, %v1597_v25 }
 0xc64   :  { %v2157_v0 = vpop.eup %2156 }
 0xc65   :  { %v1598_v1 = vmul.f32 %v2157_v0, %v1582_v60  ;;  %v1609_v3 = vadd.f32 %v1608_v8, %v1603_v27  ;;  %v1834_v0 = vrot.slane %v2459_v14, %v1833_v24 }
 0xc67   :  { %v1604_v29 = vmul.f32 %v1602_v23, %v1598_v1  ;;  %v2465_v30 = vadd.f32 %v1609_v3, %v2250_v2  ;;  %v1722_v2 = vld [vmem:[%s2540_s2 + $0x70] sm:$0xff]  ;;  %v1827_v23 = vsub.s32 2, %v2302_v12 }
 0xc68   :  { %2070 = vmatprep.subr.mxu0 %v1722_v2 }
 0xc69   :  { %v1610_v31 = vadd.f32 %v1608_v8, %v1604_v29  ;;  %2065 = vmatprep.mubr.msk.f32.mxu1 %vm29_vm0, %v2465_v30  ;;  %2071 = vmatpush3.msra.mxu0 %v1722_v2  ;;  %v1828_v25 = vrot.slane %v2459_v14, %v1827_v23 }
 0xc6b   :  { %v2470_v32 = vadd.f32 %v1610_v31, %v2272_v5  ;;  %v1721_v5 = vld [vmem:[%s2540_s2 + $0x68] sm:$0xff]  ;;  %s2209_s2 = smov [#allocation2]  }
 0xc6c   :  { %2072 = vmatprep.subr.mxu0 %v1721_v5  ;;  %s1846_s0 = sshll.u32 %s2209_s2, 4  ;;  %s1847_s0 = int_to_ptr.vmem [resolvable:$true] %s1846_s0 }
 0xc6d   :  { %2066 = vmatmul.mubr.msk.f32.vlgmr.msra.gmra.mxu1 %vm29_vm0, %v2470_v32  ;;  %2073 = vmatpush3.msra.mxu0 %v1721_v5  ;;  %s2170_s27 = scalar_lea.vmem %s1847_s0, 256  ;;  %p2175_p1 = scmp.lt.s32.totalorder %s1847_s0, %s1847_s0 }
 0xc6e   :  { %2074 = vmatprep.subr.mxu0 %v1720_v33  ;;  %p2171_p0 = scmp.ne.s32.totalorder %s1847_s0, %s2170_s27  ;;  %p2176_p2 = scmp.lt.s32.totalorder %s2170_s27, %s2170_s27 }
 0xc6f   :  { %2075 = vmatpush3.msra.mxu0 %v1720_v33 }
 0xc70   :  { %2076 = vmatprep.subr.mxu0 %v1719_v26  ;;  %p2177_p3 = por %p2176_p2, %p2175_p1 }
 0xc71   :  { %2077 = vmatpush3.msra.mxu0 %v1719_v26 }
 0xc72   :  { %2078 = vmatprep.subr.mxu0 %v1718_v34  ;;  %p2178_p4 = pnand %p2177_p3, %p2171_p0 }
 0xc73   :  { %2079 = vmatpush3.msra.mxu0 %v1718_v34 }
 0xc74   :  { %2080 = vmatprep.subr.mxu0 %v1717_v4 }
 0xc75   :  { %2081 = vmatpush3.msra.mxu0 %v1717_v4 }
 0xc76   :  { %2082 = vmatprep.subr.mxu0 %v1716_v28 }
 0xc77   :  { %2083 = vmatpush3.msra.mxu0 %v1716_v28 }
 0xc78   :  { %2084 = vmatprep.subr.mxu0 %v1715_v35 }
 0xc79   :  { %2085 = vmatpush3.msra.mxu0 %v1715_v35 }
 0xc7a   :  { %2086 = vmatprep.subr.mxu0 %v1714_v36 }
 0xc7b   :  { %2087 = vmatpush3.msra.mxu0 %v1714_v36 }
 0xc7c   :  { %2088 = vmatprep.subr.mxu0 %v1713_v37 }
 0xc7d   :  { %2089 = vmatpush3.msra.mxu0 %v1713_v37 }
 0xc7e   :  { %2090 = vmatprep.subr.mxu0 %v1712_v38 }
 0xc7f   :  { %2091 = vmatpush3.msra.mxu0 %v1712_v38 }
 0xc80   :  { %2092 = vmatprep.subr.mxu0 %v1711_v39 }
 0xc81   :  { %2093 = vmatpush3.msra.mxu0 %v1711_v39 }
 0xc82   :  { %2094 = vmatprep.subr.mxu0 %v1710_v40 }
 0xc83   :  { %2095 = vmatpush3.msra.mxu0 %v1710_v40 }
 0xc84   :  { %2096 = vmatprep.subr.mxu0 %v1709_v41 }
 0xc85   :  { %2097 = vmatpush3.msra.mxu0 %v1709_v41 }
 0xc86   :  { %2098 = vmatprep.subr.mxu0 %v1708_v42 }
 0xc87   :  { %2099 = vmatpush3.msra.mxu0 %v1708_v42 }
 0xd2d   :  { %v2067_v43 = vpop.f32.mrf.mxu1 }
 0xd2e   :  { %v1695_v44 = vsub.f32 0.0, %v2067_v43 }
 0xd2f   :  { %v1685_v46 = vpop.f32.mrf.mxu1 }
 0xd30   :  { %v1698_v48 = vmul.f32 1.442695, %v1695_v44  ;;  %v1694_v49 = vsub.f32 0.0, %v1685_v46 }
 0xd32   :  { %2158 = vpow2.f32 %v1698_v48  ;;  %v1696_v50 = vmul.f32 1.442695, %v1694_v49 }
 0xd34   :  { %2160 = vpow2.f32 %v1696_v50 }
 0xd3f   :  { %v2159_v51 = vpop.eup %2158 }
 0xd40   :  { %v1701_v52 = vadd.f32 1.0, %v2159_v51 }
 0xd41   :  { %v2161_v53 = vpop.eup %2160 }
 0xd42   :  { %v1700_v54 = vadd.f32 1.0, %v2161_v53  ;;  %2162 = vrcp.f32 %v1701_v52 }
 0xd44   :  { %2164 = vrcp.f32 %v1700_v54 }
 0xd4f   :  { %v2163_v45 = vpop.eup %2162 }
 0xd50   :  { %v1707_v57 = vmul.f32 %v2163_v45, %v2067_v43 }
 0xd51   :  { %v2165_v55 = vpop.eup %2164 }
 0xd52   :  { %v1706_v56 = vmul.f32 %v2165_v55, %v1685_v46 }
 0xd54   :  { %2100 = vmatprep.mubr.f32.mxu0 %v1706_v56 }
 0xd55   :  { %2101 = vmatmul.mubr.f32.vlgmr.msra.gmra.mxu0 %v1707_v57 }
 0xe15   :  { %v2102_v58 = vpop.f32.mrf.mxu0 }
 0xe16   :  { %v1802_v59 = vsel %vm29_vm0, %v2102_v58, 0.0 }
 0xe17   :  { %1803 = vadd.xlane.f32.xlu0 %v1802_v59  ;;  %v1790_v60 = vpop.f32.mrf.mxu0 }
 0xe18   :  { %v1799_v61 = vsel %vm29_vm0, %v1790_v60, 0.0 }
 0xe19   :  { %1800 = vadd.xlane.f32.xlu1 %v1799_v61 }
 0xea0   :  { %v1804_v47 = vpop.xlane.xlu0 %1803 }
 0xea1   :  { %v1806_v62 = vmul.f32 0.03125, %v1804_v47 }
 0xea2   :  { %v1801_v63 = vpop.xlane.xlu1 %1800 }
 0xea3   :  { %v1808_v9 = vsub.f32 %v2102_v58, %v1806_v62  ;;  %v1805_v10 = vmul.f32 0.03125, %v1801_v63 }
 0xea5   :  { %v1807_v11 = vsub.f32 %v1790_v60, %v1805_v10  ;;  %v1810_v13 = vmul.f32 %v1808_v9, %v1808_v9 }
 0xea7   :  { %v1814_v15 = vsel %vm29_vm0, %v1810_v13, 0.0  ;;  %v1809_v16 = vmul.f32 %v1807_v11, %v1807_v11 }
 0xea8   :  { %1815 = vadd.xlane.f32.xlu0 %v1814_v15 }
 0xea9   :  { %v1811_v17 = vsel %vm29_vm0, %v1809_v16, 0.0 }
 0xeaa   :  { %1812 = vadd.xlane.f32.xlu1 %v1811_v17 }
 0xf31   :  { %v1816_v18 = vpop.xlane.xlu0 %1815 }
 0xf32   :  { %v1818_v19 = vmul.f32 0.03125, %v1816_v18 }
 0xf33   :  { %v1813_v20 = vpop.xlane.xlu1 %1812 }
 0xf34   :  { %v1820_v6 = vadd.f32 1e-05, %v1818_v19  ;;  %v1817_v21 = vmul.f32 0.03125, %v1813_v20 }
 0xf36   :  { %2166 = vrsqrt.f32 %v1820_v6  ;;  %v1819_v22 = vadd.f32 1e-05, %v1817_v21 }
 0xf38   :  { %2168 = vrsqrt.f32 %v1819_v22 }
 0xf43   :  { %v2167_v8 = vpop.eup %2166 }
 0xf44   :  { %v1824_v27 = vmul.f32 %v2167_v8, %v1808_v9 }
 0xf45   :  { %v2169_v1 = vpop.eup %2168 }
 0xf46   :  { %v1823_v3 = vmul.f32 %v2169_v1, %v1807_v11  ;;  %v1830_v29 = vmul.f32 %v1828_v25, %v1824_v27 }
 0xf48   :  { %v1829_v31 = vmul.f32 %v1828_v25, %v1823_v3  ;;  %v1836_v7 = vadd.f32 %v1834_v0, %v1830_v29 }
 0xf4a   :  { %v1835_v2 = vadd.f32 %v1834_v0, %v1829_v31  ;;  %v1838_v5 = vadd.f32 %v1836_v7, %v2470_v32 }
 0xf4c   :  { %v1837_v33 = vadd.f32 %v1835_v2, %v2465_v30  ;;  %1840 = vst.msk [vmem:[#allocation2 + $0x8] sm:$0xff] %vm29_vm0, %v1838_v5 }
 0xf4e   :  { %1839 = vst.msk [vmem:[#allocation2] sm:$0xff] %vm29_vm0, %v1837_v33 }
 0xf4f   :  { %2181 = shalt.err (!%p2178_p4)
}
 0xf50   :  { %s2210_s28 = smov 128  }
 0xf51   :  { %1852 = dma.vmem_to_hbm [thread:$0]  %s1847_s0, 256, %s2542_s4, [#allocation3], %s2210_s28, %s2210_s28, %s2207_s13  }
 0xf52   :  { %2190 = dma.done.wait [#allocation3], 256  }
 0xf53   :  { %2191 = vsyncadd [#allocation3], 4294967040 }
 0xf54   :  { %1856 = vsyncpa [#allocation3], 1 }

</bundles_post_ra>
